<compile_context>
chip_gen: v6e
topology: v6e:2x2x1
jax: 0.10.0
libtpu: 0.0.40
codegen_flags: <defaults>
</compile_context>

<pallas_src>
import warnings

import jax
import jax.numpy as jnp
from jax.experimental import pallas as pl
from jax.experimental.pallas import tpu as pltpu


# ---------------------------------------------------------------------------
# Hardware-aware sizing helpers
# ---------------------------------------------------------------------------

def _vmem_capacity_bytes() -> int:
    """Physical VMEM per TensorCore; conservative fallback if unqueryable."""
    try:
        cap = int(pltpu.get_tpu_info().vmem_capacity_bytes)
        if cap > 0:
            return cap
    except Exception:
        pass
    return 64 << 20  # v7x has the smallest VMEM (64 MiB) — safe everywhere.


def _sublane_multiple(itemsize: int) -> int:
    # f32 -> 8 rows per sublane group, bf16 -> 16, int8/fp8 -> 32.
    return max(8, 32 // max(1, itemsize))


def _round_up(n: int, m: int) -> int:
    return ((n + m - 1) // m) * m


def _choose_tile_rows(S: int, row_bytes: int, sublane: int, budget_bytes: int,
                      min_grid_steps: int, parallel_factor: int) -> int:
    """Sublane-aligned row tile that fits the byte budget while leaving at
    least `min_grid_steps` total grid steps (counting the independent
    `parallel_factor` grid axis) whenever S allows."""
    max_rows = max(sublane,
                   (budget_bytes // max(1, row_bytes)) // sublane * sublane)
    ts = min(max_rows, _round_up(S, sublane))
    needed_s_tiles = -(-min_grid_steps // max(1, parallel_factor))  # cdiv
    if needed_s_tiles > 1:
        ts = min(ts, max(sublane, _round_up(-(-S // needed_s_tiles), sublane)))
    if ts >= S:
        return S  # full extent is always a legal block dim
    return ts


def _vmem_limit_bytes(tile_bytes: int, capacity: int) -> int:
    # in + out, double-buffered, plus slack; stay well inside physical VMEM.
    want = 4 * tile_bytes + (4 << 20)
    return int(min(max(32 << 20, want), (capacity * 3) // 4))


# ---------------------------------------------------------------------------
# Kernels
# ---------------------------------------------------------------------------

def _copy_tile_kernel(x_ref, o_ref):
    # Pure copy: the (1, 0, 2) permutation is carried entirely by the
    # BlockSpec index_maps, so no sublane relayout happens inside the kernel.
    o_ref[...] = x_ref[...]


def _swap01_tile_kernel(x_ref, o_ref):
    # Fallback when the output cannot be written as a lane-dense (S, B*D)
    # slab (D not a multiple of 128 and B > 1): swap only the two leading
    # (non-lane) dims of the tile.
    o_ref[...] = jnp.transpose(x_ref[...], (1, 0, 2))


# ---------------------------------------------------------------------------
# Fast path: 3-D (B, S, D) with dims == (1, 0, 2)  (lane dim untouched).
# ---------------------------------------------------------------------------

def _permute_102_lane_dense(x, tile_rows, vmem_limit):
    """(B, S, D) -> (S, B, D) via a 2-D grid of pure-copy blocks.

    Input block  : (Squeezed, TS, D)  at (b, i*TS, 0)   — contiguous read.
    Output block : (TS, D) of an (S, B*D) slab at (i*TS, b*D) — lane-dense,
                   unmasked stores; strided HBM writes of D*itemsize bytes.
    """
    B, S, D = x.shape
    itemsize = jnp.dtype(x.dtype).itemsize
    grid = (B, pl.cdiv(S, tile_rows))
    out2d = pl.pallas_call(
        _copy_tile_kernel,
        out_shape=jax.ShapeDtypeStruct((S, B * D), x.dtype),
        grid=grid,
        in_specs=[pl.BlockSpec((pl.Squeezed(), tile_rows, D),
                               lambda b, i: (b, i, 0))],
        out_specs=pl.BlockSpec((tile_rows, D), lambda b, i: (i, b)),
        compiler_params=pltpu.CompilerParams(
            dimension_semantics=("parallel", "parallel"),
            vmem_limit_bytes=vmem_limit),
        cost_estimate=pl.CostEstimate(flops=0, transcendentals=0,
                                      bytes_accessed=2 * x.size * itemsize),
    )(x)
    return out2d.reshape(S, B, D)  # contiguous reshape: free


def _permute_102_transpose(x, tile_rows, vmem_limit):
    """Fallback 1-D grid with an in-tile (1,0,2) transpose (rare: D % 128 != 0)."""
    B, S, D = x.shape
    itemsize = jnp.dtype(x.dtype).itemsize
    grid = (pl.cdiv(S, tile_rows),)
    return pl.pallas_call(
        _swap01_tile_kernel,
        out_shape=jax.ShapeDtypeStruct((S, B, D), x.dtype),
        grid=grid,
        in_specs=[pl.BlockSpec((B, tile_rows, D), lambda i: (0, i, 0))],
        out_specs=pl.BlockSpec((tile_rows, B, D), lambda i: (i, 0, 0)),
        compiler_params=pltpu.CompilerParams(
            dimension_semantics=("parallel",),
            vmem_limit_bytes=vmem_limit),
        cost_estimate=pl.CostEstimate(flops=0, transcendentals=0,
                                      bytes_accessed=2 * x.size * itemsize),
    )(x)


def _permute_102(x, tile_rows=None):
    B, S, D = x.shape
    itemsize = jnp.dtype(x.dtype).itemsize
    sublane = _sublane_multiple(itemsize)
    capacity = _vmem_capacity_bytes()
    # ~5 MiB tiles on v7x (64 MiB VMEM), ~8 MiB on v5e/v6e (128 MiB VMEM).
    budget = max(1 << 20, min(8 << 20, capacity // 12))

    # Lane-dense path: output written as an (S, B*D) slab whose per-block last
    # dim is D — legal & unmasked when D is a lane multiple (or B == 1, where
    # D == B*D is the full extent anyway).
    lane_dense = (D % 128 == 0) or (B == 1)
    row_bytes = (D if lane_dense else B * D) * itemsize
    parallel_factor = B if lane_dense else 1

    if tile_rows is None:
        tile_rows = _choose_tile_rows(S, row_bytes, sublane, budget,
                                      min_grid_steps=4,
                                      parallel_factor=parallel_factor)
    else:
        tr = int(tile_rows)
        if tr <= 0 or tr >= S:
            tr = S
        elif tr % sublane != 0:
            new_tr = max(sublane, (tr // sublane) * sublane)
            if new_tr >= S:
                new_tr = S
            warnings.warn(
                f"tile_rows={tr} is not a multiple of the sublane group "
                f"({sublane}); using tile_rows={new_tr} instead.")
            tr = new_tr
        tile_rows = tr

    tile_bytes = tile_rows * row_bytes           # per-step in tile == out tile
    vmem_limit = _vmem_limit_bytes(tile_bytes, capacity)

    if lane_dense:
        return _permute_102_lane_dense(x, tile_rows, vmem_limit)
    return _permute_102_transpose(x, tile_rows, vmem_limit)


# ---------------------------------------------------------------------------
# Generic fallback: arbitrary `dims` (may move the lane dim).  Whole-array
# single block — gated to small tensors so it cannot VMEM-OOM on any chip.
# ---------------------------------------------------------------------------

_GENERIC_PALLAS_MAX_BYTES = 4 << 20


def _make_transpose_kernel(dims):
    def kernel(x_ref, o_ref):
        o_ref[...] = jnp.transpose(x_ref[...], dims)
    return kernel


def _permute_generic(x, dims):
    out_shape = tuple(x.shape[d] for d in dims)
    ndim = x.ndim
    itemsize = jnp.dtype(x.dtype).itemsize
    nbytes = x.size * itemsize
    vmem_limit = int(min(max(16 << 20, 4 * nbytes + (2 << 20)),
                         (_vmem_capacity_bytes() * 3) // 4))
    return pl.pallas_call(
        _make_transpose_kernel(dims),
        out_shape=jax.ShapeDtypeStruct(out_shape, x.dtype),
        grid=(1,),
        in_specs=[pl.BlockSpec(x.shape, lambda i: (0,) * ndim)],
        out_specs=pl.BlockSpec(out_shape, lambda i: (0,) * ndim),
        compiler_params=pltpu.CompilerParams(vmem_limit_bytes=vmem_limit),
        cost_estimate=pl.CostEstimate(flops=0, transcendentals=0,
                                      bytes_accessed=2 * nbytes),
    )(x)


# ---------------------------------------------------------------------------
# Public wrapper / module
# ---------------------------------------------------------------------------

def pallas_permute(x, dims, tile_rows=None):
    """Equivalent of torch.Tensor.permute(*dims), computed with Pallas."""
    ndim = x.ndim
    dims = tuple(int(d) % ndim for d in dims)
    if sorted(dims) != list(range(ndim)):
        raise ValueError(f"dims {dims} is not a permutation of {ndim} axes")

    # Identity permutation: nothing to do (torch returns a view).
    if dims == tuple(range(ndim)):
        return x

    # Transformer fast path: (B, S, D) -> (S, B, D), lane dim preserved.
    if ndim == 3 and dims == (1, 0, 2):
        return _permute_102(x, tile_rows=tile_rows)

    # Other permutations: whole-array Pallas kernel only for small tensors.
    if x.size * jnp.dtype(x.dtype).itemsize <= _GENERIC_PALLAS_MAX_BYTES:
        return _permute_generic(x, dims)
    # TODO(synk): large arbitrary (lane-moving) permutes are handed to XLA —
    # a tiled Pallas XLU-transpose kernel is possible but not implemented here.
    return jnp.transpose(x, dims)


class Permute:
    """JAX/Pallas mirror of the PyTorch Permute nn.Module."""

    def __init__(self, *dims):
        self.dims = dims

    def __call__(self, x):
        return pallas_permute(x, self.dims)


if __name__ == "__main__":
    key = jax.random.PRNGKey(0)
    k1, k2, k3, k4 = jax.random.split(key, 4)

    # 1) Transformer fast path: (batch, seq, hidden) -> (seq, batch, hidden),
    #    lane-dense hidden (multiple of 128).  Auto tiling -> 2-D grid (2, 2).
    B, S, D = 2, 16, 128
    x = jax.random.normal(k1, (B, S, D), dtype=jnp.float32)
    module = Permute(1, 0, 2)
    out = jax.block_until_ready(module(x))
    ref = jnp.transpose(x, (1, 0, 2))
    assert out.shape == (S, B, D) and out.dtype == x.dtype
    assert jnp.array_equal(out, ref), "fast path mismatch"

    # 2) Explicit tile with a ragged edge block (S not a multiple of tile_rows).
    x2 = jax.random.normal(k2, (2, 24, 128), dtype=jnp.float32)
    out2 = jax.block_until_ready(pallas_permute(x2, (1, 0, 2), tile_rows=16))
    assert jnp.array_equal(out2, jnp.transpose(x2, (1, 0, 2))), "ragged tile mismatch"

    # 3) Non-128-multiple hidden size -> in-kernel transpose fallback path.
    x3 = jax.random.normal(k3, (2, 8, 32), dtype=jnp.float32)
    out3 = jax.block_until_ready(pallas_permute(x3, (1, 0, 2)))
    assert jnp.array_equal(out3, jnp.transpose(x3, (1, 0, 2))), "fallback mismatch"

    # 4) Generic small permutation (2-D transpose) via the whole-array kernel.
    x4 = jax.random.normal(k4, (8, 128), dtype=jnp.float32)
    out4 = jax.block_until_ready(pallas_permute(x4, (1, 0)))
    assert jnp.array_equal(out4, jnp.transpose(x4, (1, 0))), "generic mismatch"

    print("KERNEL_OK")
</pallas_src>

<mosaic_0001>
module attributes {stable_mosaic.version = 11 : i64} {
  func.func @_copy_tile_kernel(%arg0: i32, %arg1: i32, %arg2: memref<1x8x128xf32, #tpu.memory_space<vmem>>, %arg3: memref<8x128xf32, #tpu.memory_space<vmem>>) attributes {dimension_semantics = [#tpu.dimension_semantics<parallel>, #tpu.dimension_semantics<parallel>], iteration_bounds = array<i64: 2, 2>, scalar_prefetch = 0 : i64, scratch_operands = 0 : i64, tpu.core_type = #tpu.core_type<tc>, window_params = [{transform_indices = @transform_0, window_bounds = array<i64: 1, 8, 128>}, {transform_indices = @transform_1, window_bounds = array<i64: 8, 128>}]} {
    %c0 = arith.constant 0 : index
    %c0_0 = arith.constant 0 : index
    %c0_1 = arith.constant 0 : index
    %0 = vector.load %arg2[%c0, %c0_0, %c0_1] : memref<1x8x128xf32, #tpu.memory_space<vmem>>, vector<1x8x128xf32>
    %1 = vector.shape_cast %0 : vector<1x8x128xf32> to vector<8x128xf32>
    %c0_2 = arith.constant 0 : index
    %c0_3 = arith.constant 0 : index
    %2 = vector.load %arg3[%c0_2, %c0_3] : memref<8x128xf32, #tpu.memory_space<vmem>>, vector<8x128xf32>
    tpu.vector_store %arg3[%c0_2, %c0_3], %1 {strides = array<i32>} : memref<8x128xf32, #tpu.memory_space<vmem>>, vector<8x128xf32>,
    return
  }
  func.func @transform_0(%arg0: i32, %arg1: i32) -> (i32, i32, i32) {
    %c0_i32 = arith.constant 0 : i32
    %c0_i32_0 = arith.constant 0 : i32
    return %arg0, %arg1, %c0_i32 : i32, i32, i32
  }
  func.func @transform_1(%arg0: i32, %arg1: i32) -> (i32, i32) {
    %c0_i32 = arith.constant 0 : i32
    return %arg1, %arg0 : i32, i32
  }
}

</mosaic_0001>

<bundles_post_ra>
// kernel: tpu_custom_call.1
= control target key start
LH: loop header
LB: loop body
LE: loop exit
PB: predicated region body
PF: predicated region fallthrough
CT: control target
= control target key end

     0   :  { %6 = vsyncpa [#allocation3], 0  ;;  %s646_s0 = inlined_call_operand.hbm [shape: f32[2,16,128], index: 0, kind: input, shape index: {}]   ;;  %s647_s1 = inlined_call_operand.hbm [shape: f32[16,256], index: 1, kind: output, shape index: {}]  }
   0x1   :  { %8 = vsyncpa [#allocation3 + $0x1], 0 }
   0x2   :  { %9 = vsyncpa [#allocation4], 0 }
   0x3   :  { %11 = vsyncpa [#allocation4 + $0x1], 0  ;;  %s484_s6 = smov 0   ;;  %s486_s7 = smov 0  }
   0x4   :  { %s488_s8 = smov 0   ;;  %s490_s9 = smov 0  }
   0x5   :  { %s492_s10 = smov 0   ;;  %s494_s11 = smov 0  }
   0x6   :  { %s496_s12 = smov 0   ;;  %s498_s13 = smov 0  }
   0x7 LB: > { %s253_s14 = sadd.s32 4294967295, %s470_s13   ;;  %s254_s15 = sadd.s32 4294967294, %s470_s13   ;;  %s470_s13 = sphi %s498_s13, %s17_s13   ;;  %s466_s12 = sphi %s496_s12, %s660_s12   ;;  %s462_s11 = sphi %s494_s11, %s659_s11   ;;  %s458_s10 = sphi %s492_s10, %s658_s10   ;;  %s454_s9 = sphi %s490_s9, %s657_s9   ;;  %s450_s8 = sphi %s488_s8, %s656_s8   ;;  %s446_s7 = sphi %s486_s7, %s655_s7   ;;  %s442_s6 = sphi %s484_s6, %s654_s6  }
   0x8   : > { %s26_s16 = sadd.s32 1, %s462_s11  ;;  %s29_s17 = sadd.s32 1, %s466_s12 }
   0x9   : > { %p27_p0 = scmp.ge.s32.totalorder %s26_s16, 2  ;;  %s38_s18 = sadd.s32 1, %s450_s8 }
   0xa   : > { %p45_p1 = scmp.ne.s32.totalorder %s450_s8, %s446_s7  ;;  %p46_p2 = scmp.eq.s32.totalorder %s470_s13, 0 }
   0xb   : > { %s662_s16 = smov (%p27_p0, %s26_s16), 0  ;;  %s664_s17 = smov (!%p27_p0, %s29_s17), %s466_s12 }
   0xc   : > { %s34_s19 = ssub.s32 %s462_s11, %s662_s16  ;;  %p537_p3 = por %p46_p2, %p45_p1 }
   0xd   : > { %p31_p4 = scmp.ge.s32.totalorder %s664_s17, 2  ;;  %p51_p5 = scmp.ne.s32.totalorder %s446_s7, %s442_s6 }
   0xe   : > { %p52_p6 = scmp.eq.s32.totalorder %s253_s14, 0  ;;  %p77_p7 = scmp.eq.s32.totalorder %s253_s14, 3 }
   0xf   : > { %s666_s17 = smov (%p31_p4, %s664_s17), 0  ;;  %p83_p10 = scmp.eq.s32.totalorder %s254_s15, 3 }
  0x10   : > { %p545_p8 = por %p52_p6, %p51_p5  ;;  %p549_p9 = por %p77_p7, %p45_p1 }
  0x11   : > { %s33_s23 = ssub.s32 %s466_s12, %s666_s17  ;;  %p555_p12 = por %p83_p10, %p51_p5 }
  0x12   : > { %s35_s24 = sor.u32 %s34_s19, %s33_s23  ;;  %p280_p13 = scmp.lt.s32.totalorder %s470_s13, 4 }
  0x13   : > { %p36_p11 = scmp.eq.s32.totalorder %s35_s24, 0  ;;  %s103_s26 = sand.u32 1, %s450_s8  }
  0x14   : > { %s651_s25 = scalar_select %p555_p12, 1, 0 }
  0x15   : > { %s562_s27 = scalar_select %p36_p11, %s450_s8, %s38_s18  }
  0x16   : > { %s257_s28 = sshll.u32 %s103_s26, 3  ;;  %s258_s29 = sshll.u32 %s466_s12, 1 }
  0x17   : > { %s112_s30 = sadd.s32 %s462_s11, %s258_s29  ;;  %s107_s2 = scalar_lea.vmem [#allocation2], %s257_s28 }
  0x18   : > { %s116_s3 = sshll.u32 %s107_s2, 4  ;;  %s259_s4 = sshll.u32 %s112_s30, 7  ;;  %s117_s3 = int_to_ptr.vmem [resolvable:$true] %s116_s3 }
  0x19   : > { %s114_s15 = scalar_lea.hbm %s646_s0, %s259_s4  ;;  %p571_p0 = pnand %p280_p13, %p537_p3 }
  0x1a   : > { %p260_p1 = scmp.ge.s32.totalorder %s470_s13, 1  ;;  %p121_p2 = scmp.lt.s32.totalorder %s470_s13, 5 }
  0x1b   : > { %s104_s18 = scalar_lea.sflag [#allocation3], %s103_s26  ;;  %p348_p4 = pneg %p571_p0 }
  0x1c   : > { %s359_s23 = scalar_lea.vmem %s117_s3, 128  ;;  %s472_s24 = smov [#allocation2]  }
  0x1d   : > { %p360_p5 = scmp.ne.s32.totalorder %s117_s3, %s359_s23  ;;  %s364_s28 = sshll.u32 %s472_s24, 4  ;;  %s365_s28 = int_to_ptr.vmem [resolvable:$false] %s364_s28 }
  0x1e   : > { %s366_s29 = scalar_lea.vmem %s365_s28, 256  ;;  %p367_p10 = scmp.lt.s32.totalorder %s117_s3, %s365_s28 }
  0x1f   : > { %p362_p6 = pnand %p360_p5, %p348_p4  ;;  %p368_p11 = scmp.lt.s32.totalorder %s366_s29, %s359_s23 }
  0x21   : > { %p363_p7 = pneg %p362_p6  ;;  %p369_p3 = por %p368_p11, %p367_p10 }
  0x23   : > { %p370_p13 = pnand %p369_p3, %p363_p7 }
  0x25   : > { %373 = shalt.err (!%p370_p13)
}
  0x26   : > { %275 = dma.hbm_to_vmem [thread:$0]  (!%p571_p0), %s114_s15, 128, %s117_s3, %s104_s18  }
  0x27   : > { %p122_p12 = pnand %p260_p1, %p121_p2 }
  0x28   : > { %s586_s20 = sand.u32 (!%p122_p12), 1, %s446_s7  }
  0x29   : > { %125 = sbr.rel (%p122_p12) target bundleno = 72 (0x48), region = 24  ;;  %s261_s26 = sshll.u32 (!%p122_p12), %s586_s20, 3 }
  0x2a   : > { %s128_s30 = scalar_lea.sflag (!%p122_p12), [#allocation3], %s586_s20  ;;  %s131_s2 = scalar_lea.vmem (!%p122_p12), [#allocation2], %s261_s26 }
  0x2e   : > { %433 = dma.done.wait (%p545_p8), %s128_s30, 128  }
  0x2f   : > { %435 = vsyncadd (%p545_p8), %s128_s30, 4294967168  ;;  %s264_s3 = sshll.u32 %s454_s9, 1  ;;  %s149_s5 = scalar_lea.vmem [#allocation5], %s261_s26  ;;  %v150_v0 = vld [vmem:[%s131_s2] sm:$0xff] }
  0x30   : > { %s164_s4 = sadd.s32 %s458_s10, %s264_s3  ;;  %s168_s14 = sshll.u32 %s149_s5, 4  ;;  %151 = vst [vmem:[%s149_s5] sm:$0xff] %v150_v0  ;;  %s596_s14 = int_to_ptr.vmem [resolvable:$true] %s168_s14 }
  0x31   : > { %s265_s15 = sshll.u32 %s164_s4, 7  ;;  %s153_s21 = scalar_lea.sflag [#allocation4], %s586_s20 }
  0x32   : > { %s166_s23 = scalar_lea.hbm %s647_s1, %s265_s15  ;;  %s374_s24 = scalar_lea.vmem %s596_s14, 128 }
  0x33   : > { %p375_p8 = scmp.ne.s32.totalorder %s596_s14, %s374_s24  ;;  %s473_s9 = smov [#allocation5]  }
  0x34   : > { %s378_s10 = sshll.u32 %s473_s9, 4  ;;  %s379_s10 = int_to_ptr.vmem [resolvable:$false] %s378_s10 }
  0x35   : > { %p376_p12 = pnand %p375_p8, %p549_p9  ;;  %s380_s28 = scalar_lea.vmem %s379_s10, 256 }
  0x36   : > { %p381_p1 = scmp.lt.s32.totalorder %s596_s14, %s379_s10  ;;  %p382_p2 = scmp.lt.s32.totalorder %s380_s28, %s374_s24 }
  0x37   : > { %p377_p0 = pneg %p376_p12 }
  0x38   : > { %p383_p4 = por %p382_p2, %p381_p1 }
  0x3a   : > { %p384_p5 = pnand %p383_p4, %p377_p0 }
  0x3c   : > { %387 = shalt.err (!%p384_p5)
}
  0x3d   : > { %s388_s29 = scalar_lea.hbm %s166_s23, 128  ;;  %s392_s30 = scalar_lea.hbm %s647_s1, 512 }
  0x3e   : > { %p389_p6 = scmp.ne.s32.totalorder %s166_s23, %s388_s29  ;;  %p393_p11 = scmp.lt.s32.totalorder %s166_s23, %s647_s1 }
  0x3f   : > { %p394_p3 = scmp.lt.s32.totalorder %s392_s30, %s388_s29 }
  0x40   : > { %p390_p7 = pnand %p389_p6, %p549_p9 }
  0x41   : > { %p395_p13 = por %p394_p3, %p393_p11 }
  0x42   : > { %p391_p10 = pneg %p390_p7 }
  0x44   : > { %p396_p8 = pnand %p395_p13, %p391_p10 }
  0x46   : > { %399 = shalt.err (!%p396_p8)
}
  0x47   : > { %270 = dma.vmem_to_hbm [thread:$0]  (%p549_p9), %s596_s14, 128, %s166_s23, %s153_s21  }
  0x48 PF: > { %p281_p12 = scmp.ge.s32.totalorder %s470_s13, 2  ;;  %s180_s4 = sand.u32 1, %s442_s6  }
  0x49   : > { %p653_p0 = scmp.ne.s32.totalorder %s651_s25, 0  ;;  %s181_s5 = scalar_lea.sflag [#allocation4], %s180_s4 }
  0x4b   : > { %p277_p1 = pnand %p281_p12, %p653_p0 }
  0x4d   : > { %p278_p2 = pneg %p277_p1 }
  0x4f   : > { %437 = dma.done.wait (%p278_p2), %s181_s5, 128  }
  0x50   : > { %439 = vsyncadd (%p278_p2), %s181_s5, 4294967168  ;;  %s17_s13 = sadd.s32 1, %s470_s13   ;;  %s654_s6 = smov %s446_s7 }
  0x51   : > { %p14_p4 = scmp.ge.s32.totalorder %s17_s13, 6   ;;  %s655_s7 = smov %s450_s8 }
  0x52   : > { %s656_s8 = smov %s562_s27  ;;  %s657_s9 = smov %s462_s11 }
  0x53   : > { %s658_s10 = smov %s466_s12  ;;  %s659_s11 = smov %s662_s16 }
  0x54   : > { %s660_s12 = smov %s666_s17  ;;  %16 = sbr.rel (!%p14_p4) target bundleno = 7 (0x7), region = 69 }
  0x59   :  { %186 = vsyncpa [#allocation3], 1 }
  0x5a   :  { %188 = vsyncpa [#allocation3 + $0x1], 1 }
  0x5b   :  { %189 = vsyncpa [#allocation4], 1 }
  0x5c   :  { %191 = vsyncpa [#allocation4 + $0x1], 1 }

</bundles_post_ra>
